<compile_context>
chip_gen: v6e
topology: v6e:2x2x1
jax: 0.10.0
libtpu: 0.0.40
codegen_flags: <defaults>
</compile_context>

<pallas_src>
import functools
import math

import jax
import jax.numpy as jnp
from jax import lax
from jax.experimental import pallas as pl
from jax.experimental.pallas import tpu as pltpu


# --------------------------------------------------------------------------
# Kernels
# --------------------------------------------------------------------------
def _onehot_kernel(ids_ref, lut_ref, out_ref, *, scale):
    """One block of embeddings via a one-hot MXU matmul (small resident table).

    ids_ref : VMEM (T, 1)      int32  -- clamped token ids for this block
    lut_ref : VMEM (vocab, D)  bf16   -- full embedding table (resident)
    out_ref : VMEM (T, D)             -- gathered rows * sqrt(d_model)
    """
    tokens = out_ref.shape[0]
    vocab = lut_ref.shape[0]

    onehot = (
        ids_ref[...] == lax.broadcasted_iota(jnp.int32, (tokens, vocab), 1)
    ).astype(lut_ref.dtype)

    gathered = jnp.dot(onehot, lut_ref[...], preferred_element_type=jnp.float32)

    # Single whole-block scale on the VPU -> wide, lane-dense stores.
    out_ref[...] = (gathered * scale).astype(out_ref.dtype)


def _gather_kernel(ids_smem, lut_hbm, out_ref, slab, copy_sems, *,
                   scale, tokens_per_block):
    """DMA row-gather for one block of tokens, double-buffered across blocks.

    ids_smem  : SMEM (n_blocks*T,) int32 -- all clamped token ids (prefetched)
    lut_hbm   : HBM  (vocab, D)          -- embedding table, never copied whole
    out_ref   : VMEM (T, D)              -- gathered rows * sqrt(d_model)
    slab      : VMEM (2, T, D)           -- manual double buffer
    copy_sems : DMA semaphores (2,)      -- one per slab slot
    """
    tpb = tokens_per_block
    i = pl.program_id(0)
    n_blocks = pl.num_programs(0)
    slot = i % 2

    def issue_block(block_idx, dst_slot):
        # One async row copy per token; all copies of a slot share one DMA sem.
        def body(t, carry):
            row = ids_smem[block_idx * tpb + t]
            pltpu.make_async_copy(
                lut_hbm.at[pl.ds(row, 1)],
                slab.at[dst_slot, pl.ds(t, 1)],
                copy_sems.at[dst_slot],
            ).start()
            return carry
        lax.fori_loop(0, tpb, body, 0)

    # Prime the pipeline: the first block fetches its own rows.
    @pl.when(i == 0)
    def _():
        issue_block(0, 0)

    # Overlap: start gathering the next block's rows into the other slot
    # before blocking on / consuming the current slot.
    @pl.when(i + 1 < n_blocks)
    def _():
        issue_block(i + 1, 1 - slot)

    # Wait for all row copies of the current slot.  Wait descriptors have the
    # same (1, D) shape as the started copies, so semaphore accounting matches.
    def wait_body(t, carry):
        pltpu.make_async_copy(
            lut_hbm.at[pl.ds(0, 1)],
            slab.at[slot, pl.ds(t, 1)],
            copy_sems.at[slot],
        ).wait()
        return carry
    lax.fori_loop(0, tpb, wait_body, 0)

    # Single whole-block scale (in f32) + lane-dense store.
    out_ref[...] = (slab[slot].astype(jnp.float32) * scale).astype(out_ref.dtype)


# --------------------------------------------------------------------------
# pallas_call builders
# --------------------------------------------------------------------------
def _build_onehot_call(n_blocks, tpb, vocab, d_model, out_dtype, scale, vmem_limit):
    grid_spec = pltpu.PrefetchScalarGridSpec(
        num_scalar_prefetch=0,
        grid=(n_blocks,),
        in_specs=[
            # Per-block token ids, (T, 1) so they broadcast against the iota.
            pl.BlockSpec((tpb, 1), lambda i: (i, 0)),
            # Whole table resident; constant block index -> only copied once,
            # though the pipeliner still allocates two buffers (budgeted below).
            pl.BlockSpec((vocab, d_model), lambda i: (0, 0)),
        ],
        out_specs=pl.BlockSpec((tpb, d_model), lambda i: (i, 0)),
    )
    return pl.pallas_call(
        functools.partial(_onehot_kernel, scale=scale),
        out_shape=jax.ShapeDtypeStruct((n_blocks * tpb, d_model), out_dtype),
        grid_spec=grid_spec,
        compiler_params=pltpu.CompilerParams(
            dimension_semantics=("parallel",),   # blocks are independent
            vmem_limit_bytes=vmem_limit,
        ),
    )


def _build_gather_call(n_blocks, tpb, vocab, d_model, lut_dtype, out_dtype,
                       scale, vmem_limit):
    grid_spec = pltpu.PrefetchScalarGridSpec(
        num_scalar_prefetch=1,                   # token ids -> SMEM
        grid=(n_blocks,),
        in_specs=[pl.BlockSpec(memory_space=pl.ANY)],   # LUT stays in HBM
        out_specs=pl.BlockSpec((tpb, d_model), lambda i, ids: (i, 0)),
        scratch_shapes=[
            pltpu.VMEM((2, tpb, d_model), lut_dtype),   # gather slab (2 slots)
            pltpu.SemaphoreType.DMA((2,)),              # one sem per slot
        ],
    )
    return pl.pallas_call(
        functools.partial(_gather_kernel, scale=scale, tokens_per_block=tpb),
        out_shape=jax.ShapeDtypeStruct((n_blocks * tpb, d_model), out_dtype),
        grid_spec=grid_spec,
        compiler_params=pltpu.CompilerParams(
            # Slab/semaphore state is carried from block i to i+1 -> not
            # safe to shard the grid axis across TensorCores.
            dimension_semantics=("arbitrary",),
            vmem_limit_bytes=vmem_limit,
        ),
    )


# --------------------------------------------------------------------------
# Sizing helpers (generation-aware)
# --------------------------------------------------------------------------
def _round_up(x, m):
    return ((x + m - 1) // m) * m


def _vmem_capacity_bytes():
    """Physical VMEM per TensorCore; conservative fallback if the query fails."""
    try:
        cap = getattr(pltpu.get_tpu_info(), "vmem_capacity_bytes", None)
        if cap:
            return int(cap)
    except Exception:
        pass
    return 64 * 1024 * 1024   # v7x per-TC size == safe lower bound everywhere


def _pick_tokens_per_block(path, d_model, vocab, lut_itemsize, table_bytes,
                           vmem_cap, n_tokens):
    if vmem_cap >= 96 << 20:                      # v5e / v6e (128 MiB VMEM)
        t = 512
    else:                                         # v7x (64 MiB per TensorCore)
        t = 256 if (path == "gather" or table_bytes < (16 << 20)) else 128
    # Keep the per-block working set well inside VMEM.
    per_token = d_model * (4 * lut_itemsize + 4)  # slab/out double-buffers + f32 tmp
    if path == "onehot":
        per_token += vocab * lut_itemsize         # in-kernel one-hot slab
    while t > 64 and t * per_token > vmem_cap // 4:
        t //= 2
    # Don't pad tiny inputs up to a full block.
    t = min(t, _round_up(max(n_tokens, 1), 8))
    return max(t, 8)


def _vmem_limit_bytes(path, tpb, vocab, d_model, lut_itemsize, table_bytes,
                      vmem_cap):
    headroom = 2 << 20
    out_bytes = tpb * d_model * lut_itemsize      # output dtype == table dtype
    if path == "onehot":
        need = (2 * table_bytes                   # pipeliner keeps 2 table buffers
                + 2 * out_bytes                   # double-buffered output blocks
                + 2 * tpb * 4                     # double-buffered ids blocks
                + tpb * vocab * lut_itemsize      # one-hot slab
                + tpb * d_model * 4               # f32 matmul accumulator
                + headroom)
    else:
        need = (2 * tpb * d_model * lut_itemsize  # manual double-buffered slab
                + 2 * out_bytes                   # double-buffered output blocks
                + tpb * d_model * 4               # f32 scale intermediate
                + headroom)
    return int(min(max(need, 4 << 20), vmem_cap))


# --------------------------------------------------------------------------
# Public wrapper
# --------------------------------------------------------------------------
def embeddings_forward(x_ids, lut, *, tokens_per_block=None, path="auto"):
    """Embedding lookup * sqrt(d_model).

    x_ids : integer token ids, any shape (...)
    lut   : (vocab, d_model) embedding table
    path  : "auto" | "gather" | "onehot"

    Returns (..., d_model) in lut.dtype.  Out-of-range ids are clamped to
    [0, vocab) rather than raising.
    """
    orig_shape = x_ids.shape
    vocab, d_model = lut.shape
    scale = float(math.sqrt(d_model))
    lut_itemsize = jnp.dtype(lut.dtype).itemsize
    table_bytes = vocab * d_model * lut_itemsize
    vmem_cap = _vmem_capacity_bytes()

    if path == "auto":
        # One-hot only pays off for small sub-32-bit tables: above ~1K vocab
        # the O(T*vocab*D) MXU work crosses the HBM roofline on every TPU
        # generation, and f32 tables need the exact (gather) path.
        use_onehot = (lut_itemsize < 4 and vocab <= 1024
                      and 2 * table_bytes <= vmem_cap // 4)
        path = "onehot" if use_onehot else "gather"
    if path not in ("onehot", "gather"):
        raise ValueError(f"unknown path {path!r}")
    if path == "onehot" and 2 * table_bytes > vmem_cap // 2:
        raise ValueError("embedding table too large for the VMEM-resident "
                         "one-hot path on this TPU generation; use path='gather'")

    n_tokens = math.prod(orig_shape)
    if tokens_per_block is None:
        tokens_per_block = _pick_tokens_per_block(
            path, d_model, vocab, lut_itemsize, table_bytes, vmem_cap, n_tokens)
    assert tokens_per_block % 8 == 0
    n_blocks = pl.cdiv(n_tokens, tokens_per_block)
    n_padded = n_blocks * tokens_per_block

    # Clamp ids so a bad id can never address outside the table; pad the
    # ragged tail (padded rows are sliced off below).
    ids = jnp.clip(jnp.reshape(x_ids, (n_tokens,)).astype(jnp.int32), 0, vocab - 1)
    if n_padded != n_tokens:
        ids = jnp.pad(ids, (0, n_padded - n_tokens))

    vmem_limit = _vmem_limit_bytes(path, tokens_per_block, vocab, d_model,
                                   lut_itemsize, table_bytes, vmem_cap)

    if path == "onehot":
        call = _build_onehot_call(n_blocks, tokens_per_block, vocab, d_model,
                                  lut.dtype, scale, vmem_limit)
        out_flat = call(ids.reshape(n_padded, 1), lut)
    else:
        call = _build_gather_call(n_blocks, tokens_per_block, vocab, d_model,
                                  lut.dtype, lut.dtype, scale, vmem_limit)
        out_flat = call(ids, lut)

    return out_flat[:n_tokens].reshape(*orig_shape, d_model)


# --------------------------------------------------------------------------
# Demo / correctness check
# --------------------------------------------------------------------------
if __name__ == "__main__":
    batch, seq = 2, 8
    vocab, d_model = 64, 128

    key = jax.random.PRNGKey(0)
    k_lut, k_ids = jax.random.split(key)

    lut_f32 = jax.random.normal(k_lut, (vocab, d_model), dtype=jnp.float32)
    x_ids = jax.random.randint(k_ids, (batch, seq), 0, vocab, dtype=jnp.int32)
    scale = math.sqrt(d_model)

    # --- Path 1: f32 table -> auto-selects the exact DMA row-gather path ---
    out = jax.block_until_ready(embeddings_forward(x_ids, lut_f32))
    ref = lut_f32[x_ids] * scale
    assert out.shape == (batch, seq, d_model)
    assert out.dtype == jnp.float32
    assert jnp.allclose(out, ref, atol=1e-5, rtol=1e-5), "gather path mismatch"

    # --- Path 2: small bf16 table -> auto-selects the one-hot MXU path ---
    lut_bf16 = lut_f32.astype(jnp.bfloat16)
    out_bf = jax.block_until_ready(embeddings_forward(x_ids, lut_bf16))
    ref_bf = (lut_bf16[x_ids].astype(jnp.float32) * scale).astype(jnp.bfloat16)
    assert out_bf.shape == (batch, seq, d_model)
    assert out_bf.dtype == jnp.bfloat16
    assert jnp.allclose(out_bf.astype(jnp.float32), ref_bf.astype(jnp.float32),
                        atol=1e-2, rtol=1e-2), "one-hot path mismatch"

    print("KERNEL_OK")
</pallas_src>

<mosaic_0001>
module attributes {stable_mosaic.version = 11 : i64} {
  func.func @_gather_kernel(%arg0: i32, %arg1: memref<16xi32, #tpu.memory_space<smem>>, %arg2: memref<64x128xf32, #tpu.memory_space<any>>, %arg3: memref<16x128xf32, #tpu.memory_space<vmem>>, %arg4: memref<2x16x128xf32, #tpu.memory_space<vmem>>, %arg5: memref<2x!tpu.dma_semaphore, #tpu.memory_space<semaphore_mem>>) attributes {dimension_semantics = [#tpu.dimension_semantics<arbitrary>], iteration_bounds = array<i64: 1>, scalar_prefetch = 1 : i64, scratch_operands = 2 : i64, tpu.core_type = #tpu.core_type<tc>, window_params = [{}, {transform_indices = @transform_1, window_bounds = array<i64: 16, 128>}]} {
    %c2_i32 = arith.constant 2 : i32
    %c0_i32 = arith.constant 0 : i32
    %0 = arith.cmpi eq, %c2_i32, %c0_i32 : i32
    %c1_i32 = arith.constant 1 : i32
    %1 = arith.select %0, %c1_i32, %c2_i32 : i32
    %2 = arith.remsi %arg0, %1 : i32
    %c0_i32_0 = arith.constant 0 : i32
    %3 = arith.cmpi ne, %2, %c0_i32_0 : i32
    %c0_i32_1 = arith.constant 0 : i32
    %4 = arith.cmpi slt, %2, %c0_i32_1 : i32
    %c0_i32_2 = arith.constant 0 : i32
    %5 = arith.cmpi slt, %1, %c0_i32_2 : i32
    %6 = arith.xori %4, %5 : i1
    %7 = arith.andi %6, %3 : i1
    %8 = arith.addi %2, %1 : i32
    %9 = arith.select %7, %8, %2 : i32
    %c0_i32_3 = arith.constant 0 : i32
    %10 = arith.cmpi eq, %arg0, %c0_i32_3 : i32
    %11 = arith.extui %10 : i1 to i32
    %c0_i32_4 = arith.constant 0 : i32
    %12 = arith.cmpi ne, %11, %c0_i32_4 : i32
    scf.if %12 {
      %c0_i32_14 = arith.constant 0 : i32
      %c16_i32_15 = arith.constant 16 : i32
      %24 = arith.addi %c0_i32_14, %c16_i32_15 : i32
      %c1_i32_16 = arith.constant 1 : i32
      scf.for %arg6 = %c0_i32_14 to %24 step %c1_i32_16  : i32 {
        %c0_i32_18 = arith.constant 0 : i32
        %25 = arith.addi %c0_i32_18, %arg6 : i32
        %26 = arith.index_cast %25 : i32 to index
        %27 = memref.load %arg1[%26] : memref<16xi32, #tpu.memory_space<smem>>
        %c0_i32_19 = arith.constant 0 : i32
        %c0_i32_20 = arith.constant 0 : i32
        %c0_i32_21 = arith.constant 0 : i32
        %28 = tpu.memref_slice %arg2[%27, %c0_i32_21] : memref<64x128xf32, #tpu.memory_space<any>> -> memref<1x128xf32, #tpu.memory_space<any>>
        %c0_i32_22 = arith.constant 0 : i32
        %29 = tpu.memref_slice %arg4[%c0_i32_19, %arg6, %c0_i32_22] : memref<2x16x128xf32, #tpu.memory_space<vmem>> -> memref<1x1x128xf32, #tpu.memory_space<vmem>>
        %30 = tpu.memref_squeeze %29 : memref<1x1x128xf32, #tpu.memory_space<vmem>> -> memref<1x128xf32, #tpu.memory_space<vmem>>
        %31 = tpu.memref_slice %arg5[%c0_i32_20] : memref<2x!tpu.dma_semaphore, #tpu.memory_space<semaphore_mem>> -> memref<1x!tpu.dma_semaphore, #tpu.memory_space<semaphore_mem>>
        %32 = tpu.memref_squeeze %31 : memref<1x!tpu.dma_semaphore, #tpu.memory_space<semaphore_mem>> -> memref<!tpu.dma_semaphore, #tpu.memory_space<semaphore_mem>>
        tpu.enqueue_dma source(%28 : memref<1x128xf32, #tpu.memory_space<any>>) target(%30 : memref<1x128xf32, #tpu.memory_space<vmem>>) target_semaphore(%32 : memref<!tpu.dma_semaphore, #tpu.memory_space<semaphore_mem>>)
      }
      %c16_i32_17 = arith.constant 16 : i32
    } else {
    }
    %c1_i32_5 = arith.constant 1 : i32
    %13 = arith.addi %arg0, %c1_i32_5 : i32
    %c1_i32_6 = arith.constant 1 : i32
    %14 = arith.cmpi slt, %13, %c1_i32_6 : i32
    %15 = arith.extui %14 : i1 to i32
    %c0_i32_7 = arith.constant 0 : i32
    %16 = arith.cmpi ne, %15, %c0_i32_7 : i32
    scf.if %16 {
      %c1_i32_14 = arith.constant 1 : i32
      %24 = arith.addi %arg0, %c1_i32_14 : i32
      %c1_i32_15 = arith.constant 1 : i32
      %25 = arith.subi %c1_i32_15, %9 : i32
      %c0_i32_16 = arith.constant 0 : i32
      %c16_i32_17 = arith.constant 16 : i32
      %26 = arith.addi %c0_i32_16, %c16_i32_17 : i32
      %c1_i32_18 = arith.constant 1 : i32
      scf.for %arg6 = %c0_i32_16 to %26 step %c1_i32_18  : i32 {
        %c16_i32_20 = arith.constant 16 : i32
        %27 = arith.muli %24, %c16_i32_20 : i32
        %28 = arith.addi %27, %arg6 : i32
        %29 = arith.index_cast %28 : i32 to index
        %30 = memref.load %arg1[%29] : memref<16xi32, #tpu.memory_space<smem>>
        %c0_i32_21 = arith.constant 0 : i32
        %31 = tpu.memref_slice %arg2[%30, %c0_i32_21] : memref<64x128xf32, #tpu.memory_space<any>> -> memref<1x128xf32, #tpu.memory_space<any>>
        %c0_i32_22 = arith.constant 0 : i32
        %32 = tpu.memref_slice %arg4[%25, %arg6, %c0_i32_22] : memref<2x16x128xf32, #tpu.memory_space<vmem>> -> memref<1x1x128xf32, #tpu.memory_space<vmem>>
        %33 = tpu.memref_squeeze %32 : memref<1x1x128xf32, #tpu.memory_space<vmem>> -> memref<1x128xf32, #tpu.memory_space<vmem>>
        %34 = tpu.memref_slice %arg5[%25] : memref<2x!tpu.dma_semaphore, #tpu.memory_space<semaphore_mem>> -> memref<1x!tpu.dma_semaphore, #tpu.memory_space<semaphore_mem>>
        %35 = tpu.memref_squeeze %34 : memref<1x!tpu.dma_semaphore, #tpu.memory_space<semaphore_mem>> -> memref<!tpu.dma_semaphore, #tpu.memory_space<semaphore_mem>>
        tpu.enqueue_dma source(%31 : memref<1x128xf32, #tpu.memory_space<any>>) target(%33 : memref<1x128xf32, #tpu.memory_space<vmem>>) target_semaphore(%35 : memref<!tpu.dma_semaphore, #tpu.memory_space<semaphore_mem>>)
      }
      %c16_i32_19 = arith.constant 16 : i32
    } else {
    }
    %c0_i32_8 = arith.constant 0 : i32
    %c16_i32 = arith.constant 16 : i32
    %17 = arith.addi %c0_i32_8, %c16_i32 : i32
    %c1_i32_9 = arith.constant 1 : i32
    scf.for %arg6 = %c0_i32_8 to %17 step %c1_i32_9  : i32 {
      %c0_i32_14 = arith.constant 0 : i32
      %c0_i32_15 = arith.constant 0 : i32
      %24 = tpu.memref_slice %arg2[%c0_i32_14, %c0_i32_15] : memref<64x128xf32, #tpu.memory_space<any>> -> memref<1x128xf32, #tpu.memory_space<any>>
      %c0_i32_16 = arith.constant 0 : i32
      %25 = tpu.memref_slice %arg4[%9, %arg6, %c0_i32_16] : memref<2x16x128xf32, #tpu.memory_space<vmem>> -> memref<1x1x128xf32, #tpu.memory_space<vmem>>
      %26 = tpu.memref_squeeze %25 : memref<1x1x128xf32, #tpu.memory_space<vmem>> -> memref<1x128xf32, #tpu.memory_space<vmem>>
      %27 = tpu.memref_slice %arg5[%9] : memref<2x!tpu.dma_semaphore, #tpu.memory_space<semaphore_mem>> -> memref<1x!tpu.dma_semaphore, #tpu.memory_space<semaphore_mem>>
      %28 = tpu.memref_squeeze %27 : memref<1x!tpu.dma_semaphore, #tpu.memory_space<semaphore_mem>> -> memref<!tpu.dma_semaphore, #tpu.memory_space<semaphore_mem>>
      tpu.wait_dma2 semaphore(%28 : memref<!tpu.dma_semaphore, #tpu.memory_space<semaphore_mem>>) src(%24 : memref<1x128xf32, #tpu.memory_space<any>>) dst(%26 : memref<1x128xf32, #tpu.memory_space<vmem>>)
    }
    %c16_i32_10 = arith.constant 16 : i32
    %18 = arith.index_cast %9 : i32 to index
    %c0 = arith.constant 0 : index
    %c0_11 = arith.constant 0 : index
    %19 = vector.load %arg4[%18, %c0, %c0_11] : memref<2x16x128xf32, #tpu.memory_space<vmem>>, vector<1x16x128xf32>
    %20 = vector.shape_cast %19 : vector<1x16x128xf32> to vector<16x128xf32>
    %cst = arith.constant 11.3137083 : f32
    %21 = vector.broadcast %cst : f32 to vector<16x128xf32>
    %22 = arith.mulf %20, %21 : vector<16x128xf32>
    %c0_12 = arith.constant 0 : index
    %c0_13 = arith.constant 0 : index
    %23 = vector.load %arg3[%c0_12, %c0_13] : memref<16x128xf32, #tpu.memory_space<vmem>>, vector<16x128xf32>
    tpu.vector_store %arg3[%c0_12, %c0_13], %22 {strides = array<i32>} : memref<16x128xf32, #tpu.memory_space<vmem>>, vector<16x128xf32>,
    return
  }
  func.func @transform_1(%arg0: i32, %arg1: memref<16xi32, #tpu.memory_space<smem>>) -> (i32, i32) {
    %c0_i32 = arith.constant 0 : i32
    %c0_i32_0 = arith.constant 0 : i32
    return %arg0, %c0_i32 : i32, i32
  }
}

</mosaic_0001>

<bundles_post_ra>
// kernel: tpu_custom_call.1
= control target key start
LH: loop header
LB: loop body
LE: loop exit
PB: predicated region body
PF: predicated region fallthrough
CT: control target
= control target key end

     0   :  { %s250_s9 = smov [#allocation5]   ;;  %s295_s0 = inlined_call_operand.hbm [shape: s32[16], index: 0, kind: input, shape index: {}]   ;;  %s296_s1 = inlined_call_operand.hbm [shape: f32[64,128], index: 1, kind: input, shape index: {}]   ;;  %s297_s2 = inlined_call_operand.hbm [shape: f32[16,128], index: 2, kind: output, shape index: {}]  }
   0x1   :  { %8 = dma.hbm_to_smem %s295_s0, 16, %s250_s9, [#allocation4] }
   0x2   :  { %236 = dma.done.wait [#allocation4], 16 }
   0x3   :  { %237 = vsyncadd [#allocation4], 4294967280 }
   0x4   :  { %10 = sfence }
   0x5   :  { %11 = vsyncpa [#allocation7], 0  ;;  %s273_s12 = smov 0  }
   0x6 LB: > { %s30_s13 = sld [smem:[#allocation5 + %s244_s12]]  ;;  %s33_s14 = scalar_lea.vmem [#allocation2], %s244_s12  ;;  %s244_s12 = sphi %s273_s12, %s29_s12  }
   0x7   : > { %s41_s15 = sshll.u32 %s33_s14, 4  ;;  %s188_s22 = scalar_lea.hbm %s296_s1, 1024  ;;  %s42_s15 = int_to_ptr.vmem [resolvable:$true] %s41_s15 }
   0xc   : > { %s151_s16 = sshll.u32 %s30_s13, 4 }
   0xd   : > { %s32_s18 = scalar_lea.hbm %s296_s1, %s151_s16 }
   0xe   : > { %s186_s19 = scalar_lea.hbm %s32_s18, 16  ;;  %p189_p1 = scmp.lt.s32.totalorder %s32_s18, %s296_s1 }
   0xf   : > { %p187_p0 = scmp.ne.s32.totalorder %s32_s18, %s186_s19  ;;  %p190_p2 = scmp.lt.s32.totalorder %s188_s22, %s186_s19 }
  0x11   : > { %p191_p3 = por %p190_p2, %p189_p1 }
  0x13   : > { %p192_p4 = pnand %p191_p3, %p187_p0 }
  0x15   : > { %195 = shalt.err (!%p192_p4)  }
  0x16   : > { %s196_s25 = scalar_lea.vmem %s42_s15, 16  ;;  %s251_s26 = smov [#allocation2]  }
  0x17   : > { %p197_p5 = scmp.ne.s32.totalorder %s42_s15, %s196_s25  ;;  %s198_s27 = sshll.u32 %s251_s26, 4  ;;  %s199_s27 = int_to_ptr.vmem [resolvable:$false] %s198_s27 }
  0x18   : > { %s200_s28 = scalar_lea.vmem %s199_s27, 512  ;;  %p201_p6 = scmp.lt.s32.totalorder %s42_s15, %s199_s27 }
  0x19   : > { %p202_p7 = scmp.lt.s32.totalorder %s200_s28, %s196_s25 }
  0x1b   : > { %p203_p8 = por %p202_p7, %p201_p6 }
  0x1d   : > { %p204_p9 = pnand %p203_p8, %p197_p5 }
  0x1f   : > { %207 = shalt.err (!%p204_p9)  }
  0x20   : > { %44 = dma.hbm_to_vmem [thread:$0]  %s32_s18, 16, %s42_s15, [#allocation3] }
  0x21   : > { %s29_s12 = sadd.s32 1, %s244_s12  }
  0x22   : > { %p26_p10 = scmp.ge.s32.totalorder %s29_s12, 16  }
  0x23   :  { %s246_s29 = smov (%p26_p10), 0  }
  0x24   :  { %28 = sbr.rel (!%p26_p10) target bundleno = 6 (0x6), region = 65 }
  0x29 LB: > { %238 = dma.done.wait [#allocation3], 16  ;;  %s248_s29 = sphi %s246_s29, %s82_s29  }
  0x2a   : > { %239 = vsyncadd [#allocation3], 4294967280  ;;  %s82_s29 = sadd.s32 1, %s248_s29  }
  0x2b   : > { %p79_p11 = scmp.ge.s32.totalorder %s82_s29, 16  }
  0x2c   :  { %v89_v0 = vld [vmem:[#allocation2] sm:$0xff] (%p79_p11)  ;;  %v90_v1 = vld [vmem:[#allocation2 + $0x8] sm:$0xff] (%p79_p11)  ;;  %s252_s30 = smov (%p79_p11), [#allocation6]  }
  0x2d   :  { %81 = sbr.rel (!%p79_p11) target bundleno = 41 (0x29), region = 87  ;;  %v91_v2 = vmul.f32 (%p79_p11), 11.313708, %v89_v0  ;;  %v92_v3 = vmul.f32 (%p79_p11), 11.313708, %v90_v1  ;;  %s100_s3 = sshll.u32 (%p79_p11), %s252_s30, 4  ;;  %s101_s3 = int_to_ptr.vmem [resolvable:$true] %s100_s3 }
  0x2e   :  { %s208_s4 = scalar_lea.vmem (%p79_p11), %s101_s3, 256  ;;  %p213_p13 = scmp.lt.s32.totalorder (%p79_p11), %s101_s3, %s101_s3 }
  0x2f   :  { %93 = vst [vmem:[#allocation6] sm:$0xff] (%p79_p11), %v91_v2  ;;  %94 = vst [vmem:[#allocation6 + $0x8] sm:$0xff] (%p79_p11), %v92_v3  ;;  %p209_p12 = scmp.ne.s32.totalorder (%p79_p11), %s101_s3, %s208_s4  ;;  %p214_p0 = scmp.lt.s32.totalorder (%p79_p11), %s208_s4, %s208_s4 }
  0x31   :  { %p215_p1 = por (%p79_p11), %p214_p0, %p213_p13 }
  0x33   :  { %p216_p2 = pnand %p215_p1, %p209_p12 }
  0x35   :  { %219 = shalt.err (!%p216_p2)
}
  0x36   :  { %s253_s1 = smov 128   ;;  %s254_s5 = smov 8  }
  0x37   :  { %106 = dma.vmem_to_hbm [thread:$0]  %s101_s3, 256, %s297_s2, [#allocation7], %s253_s1, %s253_s1, %s254_s5  }
  0x38   :  { %240 = dma.done.wait [#allocation7], 256  }
  0x39   :  { %241 = vsyncadd [#allocation7], 4294967040 }
  0x3a   :  { %110 = vsyncpa [#allocation7], 1 }
  0x3b   :  { %111 = vsyncmov [#allocation3] }
  0x3e   :  { %s112_s8 = vpop.sfrf %111 }
  0x3f   :  { %p154_p3 = scmp.ne.s32.totalorder %s112_s8, 0 }
  0x41   :  { %116 = shalt.err (%p154_p3)  }
  0x42   :  { %118 = vsyncmov [#allocation3 + $0x1] }
  0x45   :  { %s119_s9 = vpop.sfrf %118 }
  0x46   :  { %p155_p4 = scmp.ne.s32.totalorder %s119_s9, 0 }
  0x48   :  { %123 = shalt.err (%p155_p4)  }

</bundles_post_ra>
